<compile_context>
chip_gen: v7x
topology: tpu7x:2x2x1
jax: 0.10.0
libtpu: 0.0.40
codegen_flags: <defaults>
</compile_context>

<pallas_src>
import math
from functools import partial

import numpy as np
import jax
import jax.numpy as jnp
from jax.experimental import pallas as pl
from jax.experimental.pallas import tpu as pltpu

N_SCORERS = 5            # create_embedder_scorers_uncertainty builds 5 Scorer heads
HID = 32                 # hidden width of every Linear stack
LATENT = 32              # DeepSet latent_dim
EMB = 16                 # DeepSet output_dim
WIDE = N_SCORERS * HID   # 160: fused width of the 5 scorer hidden layers


def _round8(n):
    return ((n + 7) // 8) * 8


def _emb_offsets(dpad):
    """Row offsets of each DeepSet weight block inside the packed [_,32] slab."""
    offs = {}
    r = 0
    offs["pw1"] = r; r += dpad
    offs["pw2"] = r; r += HID
    offs["pw3"] = r; r += HID
    offs["rw1"] = r; r += HID
    offs["rw2"] = r; r += HID
    offs["rw3"] = r; r += HID
    return offs, r


def _sc_offsets(qpad):
    """Row offsets of each fused-scorer weight block inside the packed [_,160] slab."""
    offs = {}
    r = 0
    offs["sw1e"] = r; r += HID     # emb part, zero-padded to 32 rows
    offs["sw1q"] = r; r += qpad    # query part, zero-padded to round8(in_dim) rows
    offs["sw2"] = r; r += WIDE     # block-diagonal
    offs["sw3"] = r; r += WIDE     # zero-padded to 160 cols
    return offs, r


def make_kernel(dpad, qpad, compute_dtype):
    """Kernel over one batch block (BB batches folded into the row dim)."""
    eo, _ = _emb_offsets(dpad)
    so, _ = _sc_offsets(qpad)
    f32 = jnp.float32
    cdt = compute_dtype

    def dot(a, w):
        # MXU matmul in compute dtype, f32 accumulation; VPU work stays f32.
        return jnp.dot(a.astype(cdt), w, preferred_element_type=f32)

    def kernel(sx_ref, qx_ref, pool_ref, bsel_ref, wemb_ref, wsc_ref, b_ref, out_ref):
        # -------- packed-weight views (all slices start on 8-row boundaries) --------
        pw1 = wemb_ref[eo["pw1"]:eo["pw1"] + dpad, :]
        pw2 = wemb_ref[eo["pw2"]:eo["pw2"] + HID, :]
        pw3 = wemb_ref[eo["pw3"]:eo["pw3"] + HID, :]
        rw1 = wemb_ref[eo["rw1"]:eo["rw1"] + HID, :]
        rw2 = wemb_ref[eo["rw2"]:eo["rw2"] + HID, :]
        rw3 = wemb_ref[eo["rw3"]:eo["rw3"] + HID, :]      # cols EMB: are exact zeros

        sw1e = wsc_ref[so["sw1e"]:so["sw1e"] + HID, :]    # rows EMB: are exact zeros
        sw1q = wsc_ref[so["sw1q"]:so["sw1q"] + qpad, :]   # rows in_dim: are exact zeros
        sw2 = wsc_ref[so["sw2"]:so["sw2"] + WIDE, :]      # block-diagonal (no cross-talk)
        sw3 = wsc_ref[so["sw3"]:so["sw3"] + WIDE, :]      # cols N_SCORERS: are exact zeros

        pb1 = b_ref[0:1, 0:HID]
        pb2 = b_ref[1:2, 0:HID]
        pb3 = b_ref[2:3, 0:HID]
        rb1 = b_ref[3:4, 0:HID]
        rb2 = b_ref[4:5, 0:HID]
        rb3 = b_ref[5:6, 0:HID]                            # cols EMB: are exact zeros
        sb1 = b_ref[6:7, :]
        sb2 = b_ref[7:8, :]
        sb3 = b_ref[8:9, :]                                # cols N_SCORERS: are exact zeros

        # ---------------- DeepSet.phi on all BB*S support rows ----------------
        # concat(s_X, s_y) already done on the host; columns padded to dpad.
        h = jnp.maximum(dot(sx_ref[...], pw1) + pb1, 0.0)
        h = jnp.maximum(dot(h, pw2) + pb2, 0.0)
        phi = dot(h, pw3) + pb3                            # [BB*S, 32]

        # ------------- per-batch set mean via precomputed pooling matrix ------
        pooled = jnp.dot(pool_ref[...], phi, preferred_element_type=f32)   # [BB, 32]

        # ---------------- DeepSet.rho (emb lives in cols :EMB) ----------------
        h = jnp.maximum(dot(pooled, rw1) + rb1, 0.0)
        h = jnp.maximum(dot(h, rw2) + rb2, 0.0)
        emb = dot(h, rw3) + rb3                            # [BB, 32], cols 16: == 0

        # -------------- 5 scorer heads fused into 3 wide matmuls --------------
        # feat = concat(emb, q_X) removed algebraically:
        #   layer1 = q_X @ W1_q + emb @ W1_emb + b1
        emb_bias = dot(emb, sw1e)                          # [BB, 160]
        eb = jnp.dot(bsel_ref[...], emb_bias, preferred_element_type=f32)  # [BB*Q, 160]

        h = jnp.maximum(dot(qx_ref[...], sw1q) + eb + sb1, 0.0)
        h = jnp.maximum(dot(h, sw2) + sb2, 0.0)
        s = dot(h, sw3) + sb3                              # [BB*Q, 160], cols 5: == 0

        # Columns N_SCORERS: of `s` are exactly zero and tanh(0) == 0, so a full
        # lane-sum over all 160 columns equals the sum over the 5 real heads.
        # (For large Q a lane-dense (BB, Q) output slab would avoid the narrow
        #  (BB*Q, 1) store; at BQ<=32 it is a single masked vst and irrelevant.)
        t = 2.0 * jnp.tanh(0.01 * s)
        out_ref[...] = jnp.sum(t, axis=1, keepdims=True) * (1.0 / N_SCORERS)

    return kernel


def _block_diag(blocks):
    r, c = blocks[0].shape
    m = jnp.zeros((len(blocks) * r, len(blocks) * c), jnp.float32)
    for i, b in enumerate(blocks):
        m = m.at[i * r:(i + 1) * r, i * c:(i + 1) * c].set(b)
    return m


def pack_params(params, in_dim, compute_dtype=jnp.bfloat16):
    """Pack the 18 weight/bias tensors into 3 contiguous slabs (done ONCE)."""
    dpad = _round8(in_dim + 1)
    qpad = _round8(in_dim)

    def pad_rows(a, rows):
        return jnp.pad(a, ((0, rows - a.shape[0]), (0, 0)))

    def pad_cols(a, cols):
        return jnp.pad(a, ((0, 0), (0, cols - a.shape[1])))

    # DeepSet weights: one [*, 32] slab; every block 8-row aligned.
    w_emb = jnp.concatenate([
        pad_rows(params["pw1"], dpad),                     # [in_dim+1,32] -> [dpad,32]
        params["pw2"], params["pw3"],
        params["rw1"], params["rw2"],
        pad_cols(params["rw3"], HID),                      # [32,16] -> [32,32], zero tail
    ], axis=0).astype(jnp.float32)

    # Scorer weights: fuse 5 heads into one [*, 160] slab.
    # TODO(synk): on v5e a 128-wide (4+1 head split) layout would avoid the
    # mostly-zero second 128x128 MXU tile; 160-wide fits one tile on v6e/v7x.
    sw1_all = jnp.concatenate([params["sw1"][i] for i in range(N_SCORERS)], axis=1)
    sw1_emb = pad_rows(sw1_all[:EMB, :], HID)              # [32,160], zero tail rows
    sw1_q = pad_rows(sw1_all[EMB:, :], qpad)               # [qpad,160], zero tail rows
    sw2_bd = _block_diag([params["sw2"][i] for i in range(N_SCORERS)])              # [160,160]
    sw3_bd = pad_cols(_block_diag([params["sw3"][i] for i in range(N_SCORERS)]), WIDE)  # [160,160]
    w_sc = jnp.concatenate([sw1_emb, sw1_q, sw2_bd, sw3_bd], axis=0).astype(jnp.float32)

    # All 9 biases in one [9, 160] slab (zero-padded lanes); kept f32 (VPU adds).
    sb1_all = jnp.concatenate([params["sb1"][i] for i in range(N_SCORERS)], axis=1)
    sb2_all = jnp.concatenate([params["sb2"][i] for i in range(N_SCORERS)], axis=1)
    sb3_all = jnp.concatenate([params["sb3"][i] for i in range(N_SCORERS)], axis=1)
    b_pack = jnp.concatenate([
        pad_cols(params["pb1"], WIDE), pad_cols(params["pb2"], WIDE),
        pad_cols(params["pb3"], WIDE), pad_cols(params["rb1"], WIDE),
        pad_cols(params["rb2"], WIDE), pad_cols(params["rb3"], WIDE),
        sb1_all, sb2_all, pad_cols(sb3_all, WIDE),
    ], axis=0).astype(jnp.float32)

    # --- load-bearing zero-pad invariants (the head mean relies on these) ---
    eo, emb_rows = _emb_offsets(dpad)
    so, sc_rows = _sc_offsets(qpad)
    assert all(v % 8 == 0 for v in list(eo.values()) + list(so.values()))
    assert w_emb.shape == (emb_rows, HID) and w_sc.shape == (sc_rows, WIDE)
    assert bool(jnp.all(w_emb[eo["rw3"]:, EMB:] == 0.0))                       # rho pad cols
    assert bool(jnp.all(w_sc[so["sw1e"] + EMB:so["sw1e"] + HID, :] == 0.0))    # emb pad rows
    assert bool(jnp.all(w_sc[so["sw1q"] + in_dim:so["sw1q"] + qpad, :] == 0.0))
    assert bool(jnp.all(w_sc[so["sw3"]:, N_SCORERS:] == 0.0))                  # head pad cols
    assert bool(jnp.all(b_pack[5:6, EMB:] == 0.0))
    assert bool(jnp.all(b_pack[8:9, N_SCORERS:] == 0.0))

    return (w_emb.astype(compute_dtype), w_sc.astype(compute_dtype), b_pack)


def _choose_block_batches(B, S, Q):
    """Largest divisor of B giving >=2 grid steps with 8-aligned row blocks."""
    for bb in range(max(1, B // 2), B + 1):
        if B % bb == 0 and (bb == B or ((bb * S) % 8 == 0 and (bb * Q) % 8 == 0)):
            return bb
    return B


def forward_fn(s_X, s_y, q_X, poolmat, bsel, w_emb, w_sc, b_pack,
               *, in_dim, block_batches, compute_dtype):
    B, S, _ = s_X.shape
    Q = q_X.shape[1]
    BB = block_batches
    assert B % BB == 0
    NB = B // BB
    assert BB == B or ((BB * S) % 8 == 0 and (BB * Q) % 8 == 0)
    dpad = _round8(in_dim + 1)
    qpad = _round8(in_dim)
    f32 = jnp.float32

    # Host/XLA-side prep: concat s_y into s_X, zero-pad to 8-aligned lane widths
    # and fold the batch into the row dimension (cheap fused XLA ops).
    s_xc = jnp.concatenate([s_X.astype(f32), s_y.astype(f32)], axis=-1)
    s_xc = jnp.pad(s_xc, ((0, 0), (0, 0), (0, dpad - (in_dim + 1)))).reshape(B * S, dpad)
    q_xp = jnp.pad(q_X.astype(f32), ((0, 0), (0, 0), (0, qpad - in_dim))).reshape(B * Q, qpad)

    kernel = make_kernel(dpad, qpad, compute_dtype)

    flops = 2 * (
        B * S * (dpad * HID + HID * HID + HID * LATENT)    # phi
        + B * (BB * S) * LATENT                            # pooling matmuls
        + B * (LATENT * HID + HID * HID + HID * HID)       # rho
        + B * HID * WIDE                                   # emb -> fused layer-1 bias
        + B * Q * BB * WIDE                                # emb broadcast matmul
        + B * Q * (qpad * WIDE + WIDE * WIDE + WIDE * WIDE)  # fused scorer stack
    )
    bytes_accessed = int(
        s_xc.size * s_xc.dtype.itemsize + q_xp.size * q_xp.dtype.itemsize
        + poolmat.size * poolmat.dtype.itemsize + bsel.size * bsel.dtype.itemsize
        + w_emb.size * w_emb.dtype.itemsize + w_sc.size * w_sc.dtype.itemsize
        + b_pack.size * b_pack.dtype.itemsize + B * Q * 4)

    out = pl.pallas_call(
        kernel,
        out_shape=jax.ShapeDtypeStruct((B * Q, 1), f32),
        grid=(NB,),
        in_specs=[
            pl.BlockSpec((BB * S, dpad), lambda i: (i, 0)),
            pl.BlockSpec((BB * Q, qpad), lambda i: (i, 0)),
            pl.BlockSpec(poolmat.shape, lambda i: (0, 0)),
            pl.BlockSpec(bsel.shape, lambda i: (0, 0)),
            pl.BlockSpec(w_emb.shape, lambda i: (0, 0)),
            pl.BlockSpec(w_sc.shape, lambda i: (0, 0)),
            pl.BlockSpec(b_pack.shape, lambda i: (0, 0)),
        ],
        out_specs=pl.BlockSpec((BB * Q, 1), lambda i: (i, 0)),
        compiler_params=pltpu.CompilerParams(dimension_semantics=("parallel",)),
        cost_estimate=pl.CostEstimate(flops=int(flops),
                                      transcendentals=int(B * Q * WIDE),
                                      bytes_accessed=bytes_accessed),
    )(s_xc, q_xp, poolmat, bsel, w_emb, w_sc, b_pack)
    return out.reshape(B, Q, 1)


_forward_jit = jax.jit(forward_fn,
                       static_argnames=("in_dim", "block_batches", "compute_dtype"))


class RankingLossSurrogatePallas:
    """Packs weights once at construction; forward is one jitted pallas_call."""

    def __init__(self, params, in_dim, compute_dtype=jnp.bfloat16):
        self.in_dim = in_dim
        self.compute_dtype = compute_dtype
        self.w_emb, self.w_sc, self.b_pack = pack_params(params, in_dim, compute_dtype)
        self._select_cache = {}

    def _selectors(self, B, S, Q):
        key = (B, S, Q)
        if key not in self._select_cache:
            BB = _choose_block_batches(B, S, Q)
            # Selection matrices for set-mean and emb->query broadcast: computed
            # on the host once per shape (kept f32 so pooling stays exact).
            poolmat = np.kron(np.eye(BB, dtype=np.float32),
                              np.full((1, S), 1.0 / S, np.float32))      # [BB, BB*S]
            bsel = np.kron(np.eye(BB, dtype=np.float32),
                           np.ones((Q, 1), np.float32))                  # [BB*Q, BB]
            self._select_cache[key] = (BB, jnp.asarray(poolmat), jnp.asarray(bsel))
        return self._select_cache[key]

    def __call__(self, s_X, s_y, q_X):
        B, S, _ = s_X.shape
        Q = q_X.shape[1]
        BB, poolmat, bsel = self._selectors(B, S, Q)
        return _forward_jit(s_X, s_y, q_X, poolmat, bsel,
                            self.w_emb, self.w_sc, self.b_pack,
                            in_dim=self.in_dim, block_batches=BB,
                            compute_dtype=self.compute_dtype)


def init_params(key, in_dim):
    """Deterministic PyTorch-default-style init (uniform +-1/sqrt(fan_in))."""
    d1 = in_dim + 1
    d2 = EMB + in_dim
    keys = list(jax.random.split(key, 64))
    ctr = [0]

    def nk():
        k = keys[ctr[0]]
        ctr[0] += 1
        return k

    def lin(fan_in, fan_out):
        bound = 1.0 / math.sqrt(fan_in)
        w = jax.random.uniform(nk(), (fan_in, fan_out), jnp.float32, -bound, bound)
        b = jax.random.uniform(nk(), (1, fan_out), jnp.float32, -bound, bound)
        return w, b

    p = {}
    # DeepSet.phi: Linear(in_dim+1,32) ReLU Linear(32,32) ReLU Linear(32,32)
    p["pw1"], p["pb1"] = lin(d1, HID)
    p["pw2"], p["pb2"] = lin(HID, HID)
    p["pw3"], p["pb3"] = lin(HID, LATENT)
    # DeepSet.rho: Linear(32,32) ReLU Linear(32,32) ReLU Linear(32,16)
    p["rw1"], p["rb1"] = lin(LATENT, HID)
    p["rw2"], p["rb2"] = lin(HID, HID)
    p["rw3"], p["rb3"] = lin(HID, EMB)
    # 5 Scorers: Linear(16+in_dim,32) ReLU Linear(32,32) ReLU Linear(32,1)
    stacks = {k: [] for k in ["sw1", "sb1", "sw2", "sb2", "sw3", "sb3"]}
    for _ in range(N_SCORERS):
        w, b = lin(d2, HID); stacks["sw1"].append(w); stacks["sb1"].append(b)
        w, b = lin(HID, HID); stacks["sw2"].append(w); stacks["sb2"].append(b)
        w, b = lin(HID, 1);  stacks["sw3"].append(w); stacks["sb3"].append(b)
    for k, v in stacks.items():
        p[k] = jnp.stack(v)
    return p


def reference_forward(s_X, s_y, q_X, p):
    """Pure-JAX reference matching the PyTorch forward (unpacked params)."""
    def mlp3(x, w1, b1, w2, b2, w3, b3):
        h = jax.nn.relu(x @ w1 + b1)
        h = jax.nn.relu(h @ w2 + b2)
        return h @ w3 + b3

    s_xy = jnp.concatenate([s_X, s_y], axis=-1)
    phi = mlp3(s_xy, p["pw1"], p["pb1"], p["pw2"], p["pb2"], p["pw3"], p["pb3"])
    pooled = jnp.mean(phi, axis=-2)
    emb = mlp3(pooled, p["rw1"], p["rb1"], p["rw2"], p["rb2"], p["rw3"], p["rb3"])
    B, Q = s_X.shape[0], q_X.shape[1]
    emb_rep = jnp.broadcast_to(emb[:, None, :], (B, Q, EMB))
    feat = jnp.concatenate([emb_rep, q_X], axis=-1)
    preds = []
    for i in range(N_SCORERS):
        s = mlp3(feat, p["sw1"][i], p["sb1"][i], p["sw2"][i], p["sb2"][i],
                 p["sw3"][i], p["sb3"][i])
        preds.append(2.0 * jnp.tanh(0.01 * s))
    return jnp.mean(jnp.stack(preds), axis=0)


if __name__ == "__main__":
    # Support set size 20 as in get_batch_HPBO; B=4 exercises the 2-step
    # "parallel" grid (one batch block per TensorCore on v7x).
    B, S, Q, in_dim = 4, 20, 8, 4
    key = jax.random.PRNGKey(0)
    k1, k2, k3, kp = jax.random.split(key, 4)
    s_X = jax.random.normal(k1, (B, S, in_dim), jnp.float32)
    s_y = jax.random.normal(k2, (B, S, 1), jnp.float32)
    q_X = jax.random.normal(k3, (B, Q, in_dim), jnp.float32)

    params = init_params(kp, in_dim)
    ref = reference_forward(s_X, s_y, q_X, params)

    # Exact path: f32 matmul operands, tight tolerance against the reference.
    surrogate_f32 = RankingLossSurrogatePallas(params, in_dim, compute_dtype=jnp.float32)
    out_f32 = jax.block_until_ready(surrogate_f32(s_X, s_y, q_X))
    assert out_f32.shape == (B, Q, 1), out_f32.shape
    assert bool(jnp.all(jnp.isfinite(out_f32)))
    assert bool(jnp.allclose(out_f32, ref, atol=1e-4)), float(jnp.max(jnp.abs(out_f32 - ref)))

    # Default path: bf16 matmul operands (MXU-native on v6e/v7x), f32 accumulation.
    # 2*tanh(0.01*s) compresses the pre-activation error ~50x, so tolerance is loose.
    surrogate = RankingLossSurrogatePallas(params, in_dim)
    out = jax.block_until_ready(surrogate(s_X, s_y, q_X))
    assert out.shape == (B, Q, 1), out.shape
    assert bool(jnp.all(jnp.isfinite(out)))
    assert bool(jnp.allclose(out, ref, atol=2e-3)), float(jnp.max(jnp.abs(out - ref)))

    print("KERNEL_OK")
</pallas_src>

<mosaic_0001>
module attributes {stable_mosaic.version = 11 : i64} {
  func.func @kernel(%arg0: i32, %arg1: memref<40x8xf32, #tpu.memory_space<vmem>>, %arg2: memref<16x8xf32, #tpu.memory_space<vmem>>, %arg3: memref<2x40xf32, #tpu.memory_space<vmem>>, %arg4: memref<16x2xf32, #tpu.memory_space<vmem>>, %arg5: memref<168x32xf32, #tpu.memory_space<vmem>>, %arg6: memref<360x160xf32, #tpu.memory_space<vmem>>, %arg7: memref<9x160xf32, #tpu.memory_space<vmem>>, %arg8: memref<16x1xf32, #tpu.memory_space<vmem>>) attributes {dimension_semantics = [#tpu.dimension_semantics<parallel>], iteration_bounds = array<i64: 2>, scalar_prefetch = 0 : i64, scratch_operands = 0 : i64, tpu.core_type = #tpu.core_type<tc>, window_params = [{transform_indices = @transform_0, window_bounds = array<i64: 40, 8>}, {transform_indices = @transform_1, window_bounds = array<i64: 16, 8>}, {pipeline_mode = #tpu.pipeline_mode<synchronous>, transform_indices = @transform_2, window_bounds = array<i64: 2, 40>}, {pipeline_mode = #tpu.pipeline_mode<synchronous>, transform_indices = @transform_3, window_bounds = array<i64: 16, 2>}, {pipeline_mode = #tpu.pipeline_mode<synchronous>, transform_indices = @transform_4, window_bounds = array<i64: 168, 32>}, {pipeline_mode = #tpu.pipeline_mode<synchronous>, transform_indices = @transform_5, window_bounds = array<i64: 360, 160>}, {pipeline_mode = #tpu.pipeline_mode<synchronous>, transform_indices = @transform_6, window_bounds = array<i64: 9, 160>}, {transform_indices = @transform_7, window_bounds = array<i64: 16, 1>}]} {
    %c0 = arith.constant 0 : index
    %c0_0 = arith.constant 0 : index
    %0 = vector.load %arg5[%c0, %c0_0] : memref<168x32xf32, #tpu.memory_space<vmem>>, vector<8x32xf32>
    %c8 = arith.constant 8 : index
    %c0_1 = arith.constant 0 : index
    %1 = vector.load %arg5[%c8, %c0_1] : memref<168x32xf32, #tpu.memory_space<vmem>>, vector<32x32xf32>
    %c40 = arith.constant 40 : index
    %c0_2 = arith.constant 0 : index
    %2 = vector.load %arg5[%c40, %c0_2] : memref<168x32xf32, #tpu.memory_space<vmem>>, vector<32x32xf32>
    %c72 = arith.constant 72 : index
    %c0_3 = arith.constant 0 : index
    %3 = vector.load %arg5[%c72, %c0_3] : memref<168x32xf32, #tpu.memory_space<vmem>>, vector<32x32xf32>
    %c104 = arith.constant 104 : index
    %c0_4 = arith.constant 0 : index
    %4 = vector.load %arg5[%c104, %c0_4] : memref<168x32xf32, #tpu.memory_space<vmem>>, vector<32x32xf32>
    %c136 = arith.constant 136 : index
    %c0_5 = arith.constant 0 : index
    %5 = vector.load %arg5[%c136, %c0_5] : memref<168x32xf32, #tpu.memory_space<vmem>>, vector<32x32xf32>
    %c0_6 = arith.constant 0 : index
    %c0_7 = arith.constant 0 : index
    %6 = vector.load %arg6[%c0_6, %c0_7] : memref<360x160xf32, #tpu.memory_space<vmem>>, vector<32x160xf32>
    %c32 = arith.constant 32 : index
    %c0_8 = arith.constant 0 : index
    %7 = vector.load %arg6[%c32, %c0_8] : memref<360x160xf32, #tpu.memory_space<vmem>>, vector<8x160xf32>
    %c40_9 = arith.constant 40 : index
    %c0_10 = arith.constant 0 : index
    %8 = vector.load %arg6[%c40_9, %c0_10] : memref<360x160xf32, #tpu.memory_space<vmem>>, vector<160x160xf32>
    %c200 = arith.constant 200 : index
    %c0_11 = arith.constant 0 : index
    %9 = vector.load %arg6[%c200, %c0_11] : memref<360x160xf32, #tpu.memory_space<vmem>>, vector<160x160xf32>
    %c0_12 = arith.constant 0 : index
    %c0_13 = arith.constant 0 : index
    %10 = vector.load %arg7[%c0_12, %c0_13] : memref<9x160xf32, #tpu.memory_space<vmem>>, vector<1x32xf32>
    %c1 = arith.constant 1 : index
    %c0_14 = arith.constant 0 : index
    %11 = vector.load %arg7[%c1, %c0_14] : memref<9x160xf32, #tpu.memory_space<vmem>>, vector<1x32xf32>
    %c2 = arith.constant 2 : index
    %c0_15 = arith.constant 0 : index
    %12 = vector.load %arg7[%c2, %c0_15] : memref<9x160xf32, #tpu.memory_space<vmem>>, vector<1x32xf32>
    %c3 = arith.constant 3 : index
    %c0_16 = arith.constant 0 : index
    %13 = vector.load %arg7[%c3, %c0_16] : memref<9x160xf32, #tpu.memory_space<vmem>>, vector<1x32xf32>
    %c4 = arith.constant 4 : index
    %c0_17 = arith.constant 0 : index
    %14 = vector.load %arg7[%c4, %c0_17] : memref<9x160xf32, #tpu.memory_space<vmem>>, vector<1x32xf32>
    %c5 = arith.constant 5 : index
    %c0_18 = arith.constant 0 : index
    %15 = vector.load %arg7[%c5, %c0_18] : memref<9x160xf32, #tpu.memory_space<vmem>>, vector<1x32xf32>
    %c6 = arith.constant 6 : index
    %c0_19 = arith.constant 0 : index
    %16 = vector.load %arg7[%c6, %c0_19] : memref<9x160xf32, #tpu.memory_space<vmem>>, vector<1x160xf32>
    %c7 = arith.constant 7 : index
    %c0_20 = arith.constant 0 : index
    %17 = vector.load %arg7[%c7, %c0_20] : memref<9x160xf32, #tpu.memory_space<vmem>>, vector<1x160xf32>
    %c8_21 = arith.constant 8 : index
    %c0_22 = arith.constant 0 : index
    %18 = vector.load %arg7[%c8_21, %c0_22] : memref<9x160xf32, #tpu.memory_space<vmem>>, vector<1x160xf32>
    %c0_23 = arith.constant 0 : index
    %c0_24 = arith.constant 0 : index
    %19 = vector.load %arg1[%c0_23, %c0_24] : memref<40x8xf32, #tpu.memory_space<vmem>>, vector<40x8xf32>
    %cst = arith.constant dense<0.000000e+00> : vector<40x32xf32>
    %20 = tpu.matmul %19, %0, %cst {dimension_numbers = #tpu.dot_dimension_numbers<[1], [0], [0], [1], [0, 0, 1, 1], [], []>} : vector<40x8xf32>, vector<8x32xf32>, vector<40x32xf32> -> vector<40x32xf32>
    %21 = vector.broadcast %10 : vector<1x32xf32> to vector<40x32xf32>
    %22 = arith.addf %20, %21 : vector<40x32xf32>
    %cst_25 = arith.constant 0.000000e+00 : f32
    %23 = vector.broadcast %cst_25 : f32 to vector<40x32xf32>
    %24 = arith.maximumf %22, %23 : vector<40x32xf32>
    %cst_26 = arith.constant dense<0.000000e+00> : vector<40x32xf32>
    %25 = tpu.matmul %24, %1, %cst_26 {dimension_numbers = #tpu.dot_dimension_numbers<[1], [0], [0], [1], [0, 0, 1, 1], [], []>} : vector<40x32xf32>, vector<32x32xf32>, vector<40x32xf32> -> vector<40x32xf32>
    %26 = vector.broadcast %11 : vector<1x32xf32> to vector<40x32xf32>
    %27 = arith.addf %25, %26 : vector<40x32xf32>
    %cst_27 = arith.constant 0.000000e+00 : f32
    %28 = vector.broadcast %cst_27 : f32 to vector<40x32xf32>
    %29 = arith.maximumf %27, %28 : vector<40x32xf32>
    %cst_28 = arith.constant dense<0.000000e+00> : vector<40x32xf32>
    %30 = tpu.matmul %29, %2, %cst_28 {dimension_numbers = #tpu.dot_dimension_numbers<[1], [0], [0], [1], [0, 0, 1, 1], [], []>} : vector<40x32xf32>, vector<32x32xf32>, vector<40x32xf32> -> vector<40x32xf32>
    %31 = vector.broadcast %12 : vector<1x32xf32> to vector<40x32xf32>
    %32 = arith.addf %30, %31 : vector<40x32xf32>
    %c0_29 = arith.constant 0 : index
    %c0_30 = arith.constant 0 : index
    %33 = vector.load %arg3[%c0_29, %c0_30] : memref<2x40xf32, #tpu.memory_space<vmem>>, vector<2x40xf32>
    %cst_31 = arith.constant dense<0.000000e+00> : vector<2x32xf32>
    %34 = tpu.matmul %33, %32, %cst_31 {dimension_numbers = #tpu.dot_dimension_numbers<[1], [0], [0], [1], [0, 0, 1, 1], [], []>} : vector<2x40xf32>, vector<40x32xf32>, vector<2x32xf32> -> vector<2x32xf32>
    %cst_32 = arith.constant dense<0.000000e+00> : vector<2x32xf32>
    %35 = tpu.matmul %34, %3, %cst_32 {dimension_numbers = #tpu.dot_dimension_numbers<[1], [0], [0], [1], [0, 0, 1, 1], [], []>} : vector<2x32xf32>, vector<32x32xf32>, vector<2x32xf32> -> vector<2x32xf32>
    %36 = vector.broadcast %13 : vector<1x32xf32> to vector<2x32xf32>
    %37 = arith.addf %35, %36 : vector<2x32xf32>
    %cst_33 = arith.constant 0.000000e+00 : f32
    %38 = vector.broadcast %cst_33 : f32 to vector<2x32xf32>
    %39 = arith.maximumf %37, %38 : vector<2x32xf32>
    %cst_34 = arith.constant dense<0.000000e+00> : vector<2x32xf32>
    %40 = tpu.matmul %39, %4, %cst_34 {dimension_numbers = #tpu.dot_dimension_numbers<[1], [0], [0], [1], [0, 0, 1, 1], [], []>} : vector<2x32xf32>, vector<32x32xf32>, vector<2x32xf32> -> vector<2x32xf32>
    %41 = vector.broadcast %14 : vector<1x32xf32> to vector<2x32xf32>
    %42 = arith.addf %40, %41 : vector<2x32xf32>
    %cst_35 = arith.constant 0.000000e+00 : f32
    %43 = vector.broadcast %cst_35 : f32 to vector<2x32xf32>
    %44 = arith.maximumf %42, %43 : vector<2x32xf32>
    %cst_36 = arith.constant dense<0.000000e+00> : vector<2x32xf32>
    %45 = tpu.matmul %44, %5, %cst_36 {dimension_numbers = #tpu.dot_dimension_numbers<[1], [0], [0], [1], [0, 0, 1, 1], [], []>} : vector<2x32xf32>, vector<32x32xf32>, vector<2x32xf32> -> vector<2x32xf32>
    %46 = vector.broadcast %15 : vector<1x32xf32> to vector<2x32xf32>
    %47 = arith.addf %45, %46 : vector<2x32xf32>
    %cst_37 = arith.constant dense<0.000000e+00> : vector<2x160xf32>
    %48 = tpu.matmul %47, %6, %cst_37 {dimension_numbers = #tpu.dot_dimension_numbers<[1], [0], [0], [1], [0, 0, 1, 1], [], []>} : vector<2x32xf32>, vector<32x160xf32>, vector<2x160xf32> -> vector<2x160xf32>
    %c0_38 = arith.constant 0 : index
    %c0_39 = arith.constant 0 : index
    %49 = vector.load %arg4[%c0_38, %c0_39] : memref<16x2xf32, #tpu.memory_space<vmem>>, vector<16x2xf32>
    %cst_40 = arith.constant dense<0.000000e+00> : vector<16x160xf32>
    %50 = tpu.matmul %49, %48, %cst_40 {dimension_numbers = #tpu.dot_dimension_numbers<[1], [0], [0], [1], [0, 0, 1, 1], [], []>} : vector<16x2xf32>, vector<2x160xf32>, vector<16x160xf32> -> vector<16x160xf32>
    %c0_41 = arith.constant 0 : index
    %c0_42 = arith.constant 0 : index
    %51 = vector.load %arg2[%c0_41, %c0_42] : memref<16x8xf32, #tpu.memory_space<vmem>>, vector<16x8xf32>
    %cst_43 = arith.constant dense<0.000000e+00> : vector<16x160xf32>
    %52 = tpu.matmul %51, %7, %cst_43 {dimension_numbers = #tpu.dot_dimension_numbers<[1], [0], [0], [1], [0, 0, 1, 1], [], []>} : vector<16x8xf32>, vector<8x160xf32>, vector<16x160xf32> -> vector<16x160xf32>
    %53 = arith.addf %52, %50 : vector<16x160xf32>
    %54 = vector.broadcast %16 : vector<1x160xf32> to vector<16x160xf32>
    %55 = arith.addf %53, %54 : vector<16x160xf32>
    %cst_44 = arith.constant 0.000000e+00 : f32
    %56 = vector.broadcast %cst_44 : f32 to vector<16x160xf32>
    %57 = arith.maximumf %55, %56 : vector<16x160xf32>
    %cst_45 = arith.constant dense<0.000000e+00> : vector<16x160xf32>
    %58 = tpu.matmul %57, %8, %cst_45 {dimension_numbers = #tpu.dot_dimension_numbers<[1], [0], [0], [1], [0, 0, 1, 1], [], []>} : vector<16x160xf32>, vector<160x160xf32>, vector<16x160xf32> -> vector<16x160xf32>
    %59 = vector.broadcast %17 : vector<1x160xf32> to vector<16x160xf32>
    %60 = arith.addf %58, %59 : vector<16x160xf32>
    %cst_46 = arith.constant 0.000000e+00 : f32
    %61 = vector.broadcast %cst_46 : f32 to vector<16x160xf32>
    %62 = arith.maximumf %60, %61 : vector<16x160xf32>
    %cst_47 = arith.constant dense<0.000000e+00> : vector<16x160xf32>
    %63 = tpu.matmul %62, %9, %cst_47 {dimension_numbers = #tpu.dot_dimension_numbers<[1], [0], [0], [1], [0, 0, 1, 1], [], []>} : vector<16x160xf32>, vector<160x160xf32>, vector<16x160xf32> -> vector<16x160xf32>
    %64 = vector.broadcast %18 : vector<1x160xf32> to vector<16x160xf32>
    %65 = arith.addf %63, %64 : vector<16x160xf32>
    %cst_48 = arith.constant 0.00999999977 : f32
    %66 = vector.broadcast %cst_48 : f32 to vector<16x160xf32>
    %67 = arith.mulf %66, %65 : vector<16x160xf32>
    %68 = math.tanh %67 : vector<16x160xf32>
    %cst_49 = arith.constant 2.000000e+00 : f32
    %69 = vector.broadcast %cst_49 : f32 to vector<16x160xf32>
    %70 = arith.mulf %69, %68 : vector<16x160xf32>
    %cst_50 = arith.constant dense<0.000000e+00> : vector<16xf32>
    %71 = vector.multi_reduction <add>, %70, %cst_50 [1] : vector<16x160xf32> to vector<16xf32>
    %72 = vector.shape_cast %71 : vector<16xf32> to vector<16x1xf32>
    %cst_51 = arith.constant 2.000000e-01 : f32
    %73 = vector.broadcast %cst_51 : f32 to vector<16x1xf32>
    %74 = arith.mulf %72, %73 : vector<16x1xf32>
    %c0_52 = arith.constant 0 : index
    %c0_53 = arith.constant 0 : index
    %75 = vector.load %arg8[%c0_52, %c0_53] : memref<16x1xf32, #tpu.memory_space<vmem>>, vector<16x1xf32>
    tpu.vector_store %arg8[%c0_52, %c0_53], %74 {strides = array<i32>} : memref<16x1xf32, #tpu.memory_space<vmem>>, vector<16x1xf32>,
    return
  }
  func.func @transform_0(%arg0: i32) -> (i32, i32) {
    %c0_i32 = arith.constant 0 : i32
    %c0_i32_0 = arith.constant 0 : i32
    return %arg0, %c0_i32 : i32, i32
  }
  func.func @transform_1(%arg0: i32) -> (i32, i32) {
    %c0_i32 = arith.constant 0 : i32
    %c0_i32_0 = arith.constant 0 : i32
    return %arg0, %c0_i32 : i32, i32
  }
  func.func @transform_2(%arg0: i32) -> (i32, i32) {
    %c0_i32 = arith.constant 0 : i32
    %c0_i32_0 = arith.constant 0 : i32
    %c0_i32_1 = arith.constant 0 : i32
    return %c0_i32, %c0_i32_0 : i32, i32
  }
  func.func @transform_3(%arg0: i32) -> (i32, i32) {
    %c0_i32 = arith.constant 0 : i32
    %c0_i32_0 = arith.constant 0 : i32
    %c0_i32_1 = arith.constant 0 : i32
    return %c0_i32, %c0_i32_0 : i32, i32
  }
  func.func @transform_4(%arg0: i32) -> (i32, i32) {
    %c0_i32 = arith.constant 0 : i32
    %c0_i32_0 = arith.constant 0 : i32
    %c0_i32_1 = arith.constant 0 : i32
    return %c0_i32, %c0_i32_0 : i32, i32
  }
  func.func @transform_5(%arg0: i32) -> (i32, i32) {
    %c0_i32 = arith.constant 0 : i32
    %c0_i32_0 = arith.constant 0 : i32
    %c0_i32_1 = arith.constant 0 : i32
    return %c0_i32, %c0_i32_0 : i32, i32
  }
  func.func @transform_6(%arg0: i32) -> (i32, i32) {
    %c0_i32 = arith.constant 0 : i32
    %c0_i32_0 = arith.constant 0 : i32
    %c0_i32_1 = arith.constant 0 : i32
    return %c0_i32, %c0_i32_0 : i32, i32
  }
  func.func @transform_7(%arg0: i32) -> (i32, i32) {
    %c0_i32 = arith.constant 0 : i32
    %c0_i32_0 = arith.constant 0 : i32
    return %arg0, %c0_i32 : i32, i32
  }
}

</mosaic_0001>

<bundles_post_ra>
// kernel: forward_fn.1
= control target key start
LH: loop header
LB: loop body
LE: loop exit
PB: predicated region body
PF: predicated region fallthrough
CT: control target
= control target key end

     0   :  { %s2008_s24 = smov 0   ;;  %s2506_s0 = inlined_call_operand.vmem [shape: f32[80,8], index: 0, kind: input, shape index: {}]   ;;  %s2507_s1 = inlined_call_operand.vmem [shape: f32[32,8], index: 1, kind: input, shape index: {}]   ;;  %s2508_s2 = inlined_call_operand.vmem [shape: f32[2,40], index: 2, kind: input, shape index: {}]   ;;  %s2509_s3 = inlined_call_operand.vmem [shape: f32[16,2], index: 3, kind: input, shape index: {}]   ;;  %s2510_s4 = inlined_call_operand.vmem [shape: f32[168,32], index: 4, kind: input, shape index: {}]   ;;  %s2511_s5 = inlined_call_operand.vmem [shape: f32[360,160], index: 5, kind: input, shape index: {}]   ;;  %s2512_s6 = inlined_call_operand.vmem [shape: f32[9,160], index: 6, kind: input, shape index: {}]   ;;  %s2513_s7 = inlined_call_operand.vmem [shape: f32[32,1], index: 7, kind: output, shape index: {}]  }
   0x1 LB: > { %s1611_s25 = sadd.s32 4294967295, %s1963_s24   ;;  %p1615_p0 = scmp.ge.s32.totalorder %s1963_s24, 1  ;;  %s1963_s24 = sphi %s2008_s24, %s17_s24  }
   0x2   : > { %p249_p1 = scmp.lt.s32.totalorder %s1963_s24, 3 }
   0x4   : > { %p250_p2 = pnand %p1615_p0, %p249_p1 }
   0x5   : > { %v304_v0 = vld [vmem:[%s2510_s4] sm:$0xff] (!%p250_p2)  ;;  %s286_s28 = smul.u32 (!%p250_p2), 5, %s1611_s25  ;;  %v1965_v1 = vmov (!%p250_p2), 0.0   ;;  %vm1966_vm0 = vmmov (!%p250_p2), 0   ;;  %v305_v2 = vld [vmem:[%s2510_s4 + $0x8] sm:$0xff] (!%p250_p2)  ;;  %v306_v3 = vld [vmem:[%s2510_s4 + $0x10] sm:$0xff] (!%p250_p2) }
   0x6   : > { %253 = sbr.rel (%p250_p2) target bundleno = 2575 (0xa0f), region = 48  ;;  %1701 = vmatprep.subr.mxu0 (!%p250_p2), %v1965_v1  ;;  %1703 = vmatprep.mubr.msk.f32.mxu0 (!%p250_p2), %vm1966_vm0, %v1965_v1  ;;  %v1967_v4 = vmov (!%p250_p2), 0.0|0.0   ;;  %v1811_v5 = vpack.c.bf16 (!%p250_p2), %v306_v3, %v305_v2  ;;  %vm432_vm1 = vcmask (!%p250_p2), 64512   ;;  %v307_v11 = vld [vmem:[%s2510_s4 + $0x18] sm:$0xff] (!%p250_p2)  ;;  %v308_v12 = vld [vmem:[%s2510_s4 + $0x20] sm:$0xff] (!%p250_p2)  ;;  %v309_v14 = vld [vmem:[%s2510_s4 + $0x28] sm:$0xff] (!%p250_p2) }
   0x7   : > { %1702 = vmatpush3.msra.mxu0 (!%p250_p2), %v304_v0  ;;  %p287_p3 = scmp.lt.s32.totalorder (!%p250_p2), %s286_s28, 9  ;;  %1810 = vmatprep.subr.bf16.mxu1 (!%p250_p2), %v1967_v4  ;;  %v1814_v13 = vpack.c.bf16 (!%p250_p2), %v308_v12, %v307_v11  ;;  %v310_v15 = vld [vmem:[%s2510_s4 + $0x30] sm:$0xff] (!%p250_p2)  ;;  %v415_v17 = vld [vmem:[%s2512_s6] ss:$0 sm:$0xff] (!%p250_p2)  ;;  %vm543_vm2 = vcmask (!%p250_p2), 261120   ;;  %v311_v38 = vld [vmem:[%s2510_s4 + $0x38] sm:$0xff] (!%p250_p2) }
   0x8   : > { %1726 = vmatprep.mubr.msk.f32.mxu1 (!%p250_p2), %vm1966_vm0, %v1965_v1  ;;  %1816 = vmatprep.subr.bf16.mxu0 (!%p250_p2), %v1967_v4  ;;  %v1817_v16 = vpack.c.bf16 (!%p250_p2), %v310_v15, %v309_v14  ;;  %v312_v39 = vld [vmem:[%s2510_s4 + $0x40] sm:$0xff] (!%p250_p2)  ;;  %vm760_vm3 = vcmask (!%p250_p2), 326656   ;;  %s1617_s17 = sshll.u32 (!%p250_p2), %s1611_s25, 1  ;;  %vm1138_vm4 = vcmask (!%p250_p2), 1041408   ;;  %vm1131_vm5 = vcmask (!%p250_p2), 15360  }
   0x9   : > { %1812 = vmatpush3.bf16.msra.mxu1 (!%p250_p2), %v1811_v5  ;;  %v1820_v40 = vpack.c.bf16 (!%p250_p2), %v312_v39, %v311_v38  ;;  %v416_v41 = vld [vmem:[%s2512_s6 + $0x1] ss:$0 sm:$0xff] (!%p250_p2)  ;;  %v417_v0 = vld [vmem:[%s2512_s6 + $0x2] ss:$0 sm:$0xff] (!%p250_p2)  ;;  %p293_p4 = scmp.lt.s32.totalorder (!%p250_p2), %s1617_s17, 3  ;;  %vm1540_vm6 = vcmask (!%p250_p2), 7168  }
   0xa   : > { %1813 = vmatprep.subr.bf16.mxu1 (!%p250_p2), %v1967_v4 }
   0xd   : > { %s2515_s28 = smov (!%p287_p3, %s286_s28), 9  ;;  %1815 = vmatpush3.bf16.msra.mxu1 %v1814_v13  ;;  %s2517_s17 = smov (!%p293_p4, %s1617_s17), 3 }
   0xe   : > { %s1616_s10 = sshll.u32 %s2515_s28, 3  ;;  %1822 = vmatprep.subr.bf16.mxu1 %v1967_v4  ;;  %s1618_s20 = sshll.u32 %s2517_s17, 3 }
   0xf   : > { %s290_s13 = scalar_lea.vmem %s2506_s0, %s1616_s10  ;;  %s296_s25 = scalar_lea.vmem %s2507_s1, %s1618_s20 }
  0x10   : > { %v427_v6 = vld [vmem:[%s290_s13] sm:$0xff]  ;;  %v428_v7 = vld [vmem:[%s290_s13 + $0x8] sm:$0xff]  ;;  %v429_v8 = vld [vmem:[%s290_s13 + $0x10] sm:$0xff]  ;;  %s302_s16 = scalar_lea.vmem %s2513_s7, %s1618_s20 }
  0x11   : > { %1704 = vmatmul.mubr.msk.f32.vlgmr.msra.gmra.mrb[0].mxu0 %vm432_vm1, %v427_v6  ;;  %v430_v9 = vld [vmem:[%s290_s13 + $0x18] sm:$0xff]  ;;  %v431_v10 = vld [vmem:[%s290_s13 + $0x20] sm:$0xff] }
  0x12   : > { %1706 = vmatprep.mubr.msk.f32.mxu0 %vm1966_vm0, %v1965_v1  ;;  %1818 = vmatpush3.bf16.msra.mxu0 %v1817_v16  ;;  %v313_v16 = vld [vmem:[%s2510_s4 + $0x48] sm:$0xff] }
  0x13   : > { %1819 = vmatprep.subr.bf16.mxu0 %v1967_v4 }
  0x15   : > { %1707 = vmatmul.mubr.msk.f32.gmra.mrb[2].mxu0 %vm432_vm1, %v428_v7 }
  0x16   : > { %1709 = vmatprep.mubr.msk.f32.mxu0 %vm1966_vm0, %v1965_v1  ;;  %1821 = vmatpush3.bf16.msra.mxu0 %v1820_v40 }
  0x17   : > { %1834 = vmatprep.subr.bf16.mxu0 %v1967_v4 }
  0x19   : > { %1710 = vmatmul.mubr.msk.f32.gmra.mrb[4].mxu0 %vm432_vm1, %v429_v8 }
  0x1a   : > { %1712 = vmatprep.mubr.msk.f32.mxu0 %vm1966_vm0, %v1965_v1 }
  0x1d   : > { %1713 = vmatmul.mubr.msk.f32.gmra.mrb[6].mxu0 %vm432_vm1, %v430_v9 }
  0x1e   : > { %1715 = vmatprep.mubr.msk.f32.mxu0 %vm1966_vm0, %v1965_v1 }
  0x21   : > { %1716 = vmatmul.mubr.msk.f32.gmra.mrb[8].mxu0 %vm432_vm1, %v431_v10 }
  0x22   : > { %1749 = vmatprep.mubr.msk.f32.mxu0 %vm1966_vm0, %v1965_v1 }
  0xe4   : > { %v514_v18 = vpop.f32.mrb[0].mxu0 }
  0xe5   : > { %v515_v19 = vadd.f32 %v514_v18, %v415_v17  ;;  %v1705_v20 = vpop.f32.mrb[1].mxu0 }
  0xe6   : > { %v759_v20 = vld [vmem:[%s2508_s2] sm:$0x3] }
  0xe7   : > { %v538_v21 = vmax.f32 %v515_v19, 0.0 }
  0xe8   : > { %v519_v22 = vpop.f32.mrb[2].mxu0 }
  0xe9   : > { %v520_v23 = vadd.f32 %v519_v22, %v415_v17  ;;  %v1708_v24 = vpop.f32.mrb[3].mxu0  ;;  %1727 = vmatmul.mubr.msk.f32.vlgmr.msra.gmra.mrb[0].mxu1 %vm543_vm2, %v538_v21  ;;  %v315_v22 = vld [vmem:[%s2510_s4 + $0x58] sm:$0xff] }
  0xea   : > { %1729 = vmatprep.mubr.msk.f32.mxu1 %vm1966_vm0, %v1965_v1 }
  0xeb   : > { %v539_v25 = vmax.f32 %v520_v23, 0.0  ;;  %v316_v23 = vld [vmem:[%s2510_s4 + $0x60] sm:$0xff] }
  0xec   : > { %v524_v26 = vpop.f32.mrb[4].mxu0  ;;  %v1832_v24 = vpack.c.bf16 %v316_v23, %v315_v22  ;;  %v1130_v22 = vld [vmem:[%s2509_s3 + $0x8] sm:$0xff] }
  0xed   : > { %v525_v27 = vadd.f32 %v524_v26, %v415_v17  ;;  %v1711_v28 = vpop.f32.mrb[5].mxu0  ;;  %1730 = vmatmul.mubr.msk.f32.gmra.mrb[2].mxu1 %vm543_vm2, %v539_v25  ;;  %v317_v25 = vld [vmem:[%s2510_s4 + $0x68] sm:$0xff]  ;;  %v318_v26 = vld [vmem:[%s2510_s4 + $0x70] sm:$0xff] }
  0xee   : > { %1732 = vmatprep.mubr.msk.f32.mxu1 %vm1966_vm0, %v1965_v1 }
  0xef   : > { %v540_v29 = vmax.f32 %v525_v27, 0.0  ;;  %v1835_v27 = vpack.c.bf16 %v318_v26, %v317_v25  ;;  %v343_v25 = vld [vmem:[%s2511_s5 + $0x90] sm:$0xff]  ;;  %v345_v26 = vld [vmem:[%s2511_s5 + $0xa0] sm:$0xff] }
  0xf0   : > { %v529_v30 = vpop.f32.mrb[6].mxu0 }
  0xf1   : > { %v530_v31 = vadd.f32 %v529_v30, %v415_v17  ;;  %v1714_v32 = vpop.f32.mrb[7].mxu0  ;;  %1733 = vmatmul.mubr.msk.f32.gmra.mrb[4].mxu1 %vm543_vm2, %v540_v29  ;;  %v319_v30 = vld [vmem:[%s2510_s4 + $0x78] sm:$0xff] }
  0xf2   : > { %1735 = vmatprep.mubr.msk.f32.mxu1 %vm1966_vm0, %v1965_v1 }
  0xf3   : > { %v541_v33 = vmax.f32 %v530_v31, 0.0  ;;  %v320_v31 = vld [vmem:[%s2510_s4 + $0x80] sm:$0xff] }
  0xf4   : > { %v534_v34 = vpop.f32.mrb[8].mxu0  ;;  %v1838_v32 = vpack.c.bf16 %v320_v31, %v319_v30  ;;  %v347_v30 = vld [vmem:[%s2511_s5 + $0xb0] sm:$0xff]  ;;  %v349_v31 = vld [vmem:[%s2511_s5 + $0xc0] sm:$0xff] }
  0xf5   : > { %1736 = vmatmul.mubr.msk.f32.gmra.mrb[6].mxu1 %vm543_vm2, %v541_v33  ;;  %v535_v35 = vadd.f32 %v534_v34, %v415_v17  ;;  %v1717_v36 = vpop.f32.mrb[9].mxu0  ;;  %v314_v17 = vld [vmem:[%s2510_s4 + $0x50] sm:$0xff]  ;;  %v321_v33 = vld [vmem:[%s2510_s4 + $0x88] sm:$0xff] }
  0xf6   : > { %1738 = vmatprep.mubr.msk.f32.mxu1 %vm1966_vm0, %v1965_v1  ;;  %v1829_v21 = vpack.c.bf16 %v314_v17, %v313_v16  ;;  %v322_v34 = vld [vmem:[%s2510_s4 + $0x90] sm:$0xff]  ;;  %v418_v36 = vld [vmem:[%s2512_s6 + $0x3] ss:$0 sm:$0xff] }
  0xf7   : > { %v542_v37 = vmax.f32 %v535_v35, 0.0  ;;  %v1841_v35 = vpack.c.bf16 %v322_v34, %v321_v33  ;;  %v354_v33 = vld [vmem:[%s2511_s5 + $0xe8] sm:$0xff]  ;;  %v1868_v34 = vpack.c.bf16 %v349_v31, %v347_v30  ;;  %v387_v30 = vld [vmem:[%s2511_s5 + $0x1f0] sm:$0xff]  ;;  %v389_v31 = vld [vmem:[%s2511_s5 + $0x200] sm:$0xff] }
  0xf9   : > { %1739 = vmatmul.mubr.msk.f32.gmra.mrb[8].mxu1 %vm543_vm2, %v542_v37 }
  0xfa   : > { %1774 = vmatprep.mubr.msk.f32.mxu1 %vm1966_vm0, %v1965_v1 }
 0x1bc   : > { %v625_v42 = vpop.f32.mrb[0].mxu1 }
 0x1bd   : > { %v626_v43 = vadd.f32 %v625_v42, %v416_v41  ;;  %v1728_v44 = vpop.f32.mrb[1].mxu1 }
 0x1be   : > { %v328_v44 = vld [vmem:[%s2511_s5 + $0x18] sm:$0xff] }
 0x1bf   : > { %v649_v45 = vmax.f32 %v626_v43, 0.0  ;;  %v326_v43 = vld [vmem:[%s2511_s5 + $0x8] sm:$0xff] }
 0x1c0   : > { %v630_v46 = vpop.f32.mrb[2].mxu1 }
 0x1c1   : > { %v631_v47 = vadd.f32 %v630_v46, %v416_v41  ;;  %v1731_v48 = vpop.f32.mrb[3].mxu1  ;;  %1750 = vmatmul.mubr.msk.f32.vlgmr.msra.gmra.mrb[10].mxu0 %vm543_vm2, %v649_v45  ;;  %v325_v45 = vld [vmem:[%s2511_s5] sm:$0xff]  ;;  %v1846_v46 = vpack.c.bf16 %v328_v44, %v326_v43  ;;  %v360_v43 = vld [vmem:[%s2511_s5 + $0x118] sm:$0xff]  ;;  %v362_v44 = vld [vmem:[%s2511_s5 + $0x128] sm:$0xff] }
 0x1c2   : > { %1752 = vmatprep.mubr.msk.f32.mxu0 %vm1966_vm0, %v1965_v1  ;;  %1836 = vmatpush3.bf16.msra.mxu0 %v1835_v27  ;;  %v330_v48 = vld [vmem:[%s2511_s5 + $0x28] sm:$0xff] }
 0x1c3   : > { %v650_v49 = vmax.f32 %v631_v47, 0.0  ;;  %1837 = vmatprep.subr.bf16.mxu0 %v1967_v4  ;;  %v327_v47 = vld [vmem:[%s2511_s5 + $0x10] sm:$0xff]  ;;  %v350_v27 = vld [vmem:[%s2511_s5 + $0xc8] sm:$0xff] }
 0x1c4   : > { %v635_v50 = vpop.f32.mrb[4].mxu1 }
 0x1c5   : > { %v636_v51 = vadd.f32 %v635_v50, %v416_v41  ;;  %v1734_v52 = vpop.f32.mrb[5].mxu1  ;;  %1753 = vmatmul.mubr.msk.f32.gmra.mrb[12].mxu0 %vm543_vm2, %v650_v49  ;;  %v332_v49 = vld [vmem:[%s2511_s5 + $0x38] sm:$0xff]  ;;  %v1848_v50 = vpack.c.bf16 %v327_v47, %v325_v45  ;;  %v359_v47 = vld [vmem:[%s2511_s5 + $0x110] sm:$0xff] }
 0x1c6   : > { %1755 = vmatprep.mubr.msk.f32.mxu0 %vm1966_vm0, %v1965_v1  ;;  %1839 = vmatpush3.bf16.msra.mxu0 %v1838_v32  ;;  %v419_v52 = vld [vmem:[%s2512_s6 + $0x4] ss:$0 sm:$0xff]  ;;  %v352_v32 = vld [vmem:[%s2511_s5 + $0xd8] sm:$0xff] }
 0x1c7   : > { %v651_v53 = vmax.f32 %v636_v51, 0.0  ;;  %v1850_v51 = vpack.c.bf16 %v332_v49, %v330_v48  ;;  %1847 = vmatprep.subr.bf16.mxu0 %v1846_v46  ;;  %v1878_v46 = vpack.c.bf16 %v362_v44, %v360_v43  ;;  %v361_v48 = vld [vmem:[%s2511_s5 + $0x120] sm:$0xff]  ;;  %v364_v49 = vld [vmem:[%s2511_s5 + $0x138] sm:$0xff]  ;;  %v402_v44 = vld [vmem:[%s2511_s5 + $0x268] sm:$0xff] }
 0x1c8   : > { %v640_v54 = vpop.f32.mrb[6].mxu1  ;;  %v400_v43 = vld [vmem:[%s2511_s5 + $0x258] sm:$0xff] }
 0x1c9   : > { %v641_v55 = vadd.f32 %v640_v54, %v416_v41  ;;  %v1737_v56 = vpop.f32.mrb[7].mxu1  ;;  %1756 = vmatmul.mubr.msk.f32.gmra.mrb[14].mxu0 %vm543_vm2, %v651_v53 }
 0x1ca   : > { %1758 = vmatprep.mubr.msk.f32.mxu0 %vm1966_vm0, %v1965_v1 }
 0x1cb   : > { %v652_v57 = vmax.f32 %v641_v55, 0.0 }
 0x1cc   : > { %v645_v58 = vpop.f32.mrb[8].mxu1 }
 0x1cd   : > { %1759 = vmatmul.mubr.msk.f32.gmra.mrb[16].mxu0 %vm543_vm2, %v652_v57  ;;  %v646_v59 = vadd.f32 %v645_v58, %v416_v41  ;;  %v1740_v60 = vpop.f32.mrb[9].mxu1  ;;  %v323_v41 = vld [vmem:[%s2510_s4 + $0x98] sm:$0xff]  ;;  %v329_v57 = vld [vmem:[%s2511_s5 + $0x20] sm:$0xff]  ;;  %v331_v58 = vld [vmem:[%s2511_s5 + $0x30] sm:$0xff] }
 0x1ce   : > { %1761 = vmatprep.mubr.msk.f32.mxu0 %vm1966_vm0, %v1965_v1  ;;  %v420_v60 = vld [vmem:[%s2512_s6 + $0x5] ss:$0 sm:$0xff] }
 0x1cf   : > { %v653_v61 = vmax.f32 %v646_v59, 0.0  ;;  %v1852_v59 = vpack.c.bf16 %v331_v58, %v329_v57  ;;  %v370_v57 = vld [vmem:[%s2511_s5 + $0x168] sm:$0xff] }
 0x1d1   : > { %1762 = vmatmul.mubr.msk.f32.gmra.mrb[18].mxu0 %vm543_vm2, %v653_v61 }
 0x1d2   : > { %1796 = vmatprep.mubr.msk.f32.mxu0 %vm1966_vm0, %v1965_v1 }
 0x294   : > { %v735_v62 = vpop.f32.mrb[10].mxu0 }
 0x295   : > { %v1751_v63 = vpop.f32.mrb[11].mxu0  ;;  %v736_v3 = vadd.f32 %v735_v62, %v417_v0 }
 0x298   : > { %v740_v2 = vpop.f32.mrb[12].mxu0 }
 0x299   : > { %v741_v5 = vadd.f32 %v740_v2, %v417_v0  ;;  %v1754_v6 = vpop.f32.mrb[13].mxu0  ;;  %v333_v2 = vld [vmem:[%s2511_s5 + $0x40] sm:$0xff] }
 0x29a   : > { %v336_v6 = vld [vmem:[%s2511_s5 + $0x58] sm:$0xff] }
 0x29b   : > { %v1823_v7 = vpack.c.bf16 %v741_v5, %v736_v3  ;;  %v1222_v3 = vld [vmem:[%s296_s25] sm:$0xff]  ;;  %v1223_v5 = vld [vmem:[%s296_s25 + $0x8] sm:$0xff] }
 0x29c   : > { %v745_v8 = vpop.f32.mrb[14].mxu0 }
 0x29d   : > { %v1757_v9 = vpop.f32.mrb[15].mxu0  ;;  %1824 = vmatpush3.bf16.msra.mxu1 %v1823_v7  ;;  %v746_v11 = vadd.f32 %v745_v8, %v417_v0  ;;  %v338_v7 = vld [vmem:[%s2511_s5 + $0x68] sm:$0xff]  ;;  %v335_v8 = vld [vmem:[%s2511_s5 + $0x50] sm:$0xff] }
 0x29e   : > { %1825 = vmatprep.subr.bf16.mxu1 %v1967_v4  ;;  %v337_v9 = vld [vmem:[%s2511_s5 + $0x60] sm:$0xff] }
 0x29f   : > { %v1856_v16 = vpack.c.bf16 %v337_v9, %v335_v8 }
 0x2a0   : > { %v750_v10 = vpop.f32.mrb[16].mxu0 }
 0x2a1   : > { %v751_v12 = vadd.f32 %v750_v10, %v417_v0  ;;  %v1760_v13 = vpop.f32.mrb[17].mxu0  ;;  %v340_v10 = vld [vmem:[%s2511_s5 + $0x78] sm:$0xff] }
 0x2a2   : > { %v1854_v13 = vpack.c.bf16 %v338_v7, %v336_v6  ;;  %v371_v6 = vld [vmem:[%s2511_s5 + $0x170] sm:$0xff]  ;;  %v373_v7 = vld [vmem:[%s2511_s5 + $0x180] sm:$0xff] }
 0x2a3   : > { %v1826_v14 = vpack.c.bf16 %v751_v12, %v746_v11  ;;  %v342_v11 = vld [vmem:[%s2511_s5 + $0x88] sm:$0xff]  ;;  %v1892_v9 = vpack.c.bf16 %v373_v7, %v371_v6 }
 0x2a4   : > { %v755_v15 = vpop.f32.mrb[18].mxu0  ;;  %v1858_v17 = vpack.c.bf16 %v342_v11, %v340_v10  ;;  %v376_v10 = vld [vmem:[%s2511_s5 + $0x198] sm:$0xff]  ;;  %v378_v11 = vld [vmem:[%s2511_s5 + $0x1a8] sm:$0xff] }
 0x2a5   : > { %1827 = vmatpush3.bf16.msra.mxu1 %v1826_v14  ;;  %v756_v18 = vadd.f32 %v755_v15, %v417_v0  ;;  %v1763_v19 = vpop.f32.mrb[19].mxu0  ;;  %v334_v0 = vld [vmem:[%s2511_s5 + $0x48] sm:$0xff]  ;;  %v1129_v15 = vld [vmem:[%s2509_s3] sm:$0xff] }
 0x2a6   : > { %1772 = vmatprep.subr.mxu1 %v1965_v1  ;;  %v341_v19 = vld [vmem:[%s2511_s5 + $0x80] sm:$0xff] }
 0x2a9   : > { %1773 = vmatpush3.msra.mxu1 %v756_v18  ;;  %v339_v18 = vld [vmem:[%s2511_s5 + $0x70] sm:$0xff] }
 0x2aa   : > { %1775 = vmatmul.mubr.msk.f32.vlgmr.msra.gmra.mrb[10].mxu1 %vm760_vm3, %v759_v20  ;;  %1828 = vmatprep.subr.bf16.mxu1 %v1967_v4  ;;  %v344_v20 = vld [vmem:[%s2511_s5 + $0x98] sm:$0xff]  ;;  %v1860_v23 = vpack.c.bf16 %v341_v19, %v339_v18  ;;  %v379_v19 = vld [vmem:[%s2511_s5 + $0x1b0] sm:$0xff] }
 0x2ab   : > { %1830 = vmatpush3.bf16.msra.mxu1 %v1829_v21  ;;  %1785 = vmatprep.mubr.msk.f32.mxu1 %vm1966_vm0, %v1965_v1  ;;  %v346_v21 = vld [vmem:[%s2511_s5 + $0xa8] sm:$0xff] }
 0x2ac   : > { %1831 = vmatprep.subr.bf16.mxu1 %v1967_v4 }
 0x2af   : > { %1833 = vmatpush3.bf16.msra.mxu1 %v1832_v24  ;;  %v1862_v24 = vpack.c.bf16 %v346_v21, %v344_v20  ;;  %v381_v20 = vld [vmem:[%s2511_s5 + $0x1c0] sm:$0xff]  ;;  %v384_v21 = vld [vmem:[%s2511_s5 + $0x1d8] sm:$0xff] }
 0x2b0   : > { %1840 = vmatprep.subr.bf16.mxu1 %v1967_v4 }
 0x37d   : > { %v830_v28 = vpop.f32.mrb[10].mxu1 }
 0x37e   : > { %1786 = vmatmul.mubr.msk.f32.vlgmr.msra.gmra.mrb[12].mxu1 %vm543_vm2, %v830_v28  ;;  %v1776_v29 = vpop.f32.mrb[11].mxu1  ;;  %v1864_v28 = vpack.c.bf16 %v345_v26, %v343_v25  ;;  %v383_v25 = vld [vmem:[%s2511_s5 + $0x1d0] sm:$0xff]  ;;  %v385_v26 = vld [vmem:[%s2511_s5 + $0x1e0] sm:$0xff] }
 0x37f   : > { %1807 = vmatprep.mubr.msk.f32.mxu1 %vm1966_vm0, %v1965_v1  ;;  %1842 = vmatpush3.bf16.msra.mxu1 %v1841_v35  ;;  %v1870_v35 = vpack.c.bf16 %v354_v33, %v352_v32  ;;  %v392_v32 = vld [vmem:[%s2511_s5 + $0x218] sm:$0xff]  ;;  %v394_v33 = vld [vmem:[%s2511_s5 + $0x228] sm:$0xff] }
 0x380   : > { %1843 = vmatprep.subr.bf16.mxu1 %v1967_v4  ;;  %v324_v4 = vld [vmem:[%s2510_s4 + $0xa0] sm:$0xff] }
 0x381   : > { %v1844_v42 = vpack.c.bf16 %v324_v4, %v323_v41  ;;  %v355_v4 = vld [vmem:[%s2511_s5 + $0xf0] sm:$0xff] }
 0x383   : > { %1845 = vmatpush3.bf16.msra.mxu1 %v1844_v42  ;;  %v357_v42 = vld [vmem:[%s2511_s5 + $0x100] sm:$0xff] }
 0x384   : > { %1230 = vmatprep.subr.mxu1 %v334_v0  ;;  %v1876_v45 = vpack.c.bf16 %v357_v42, %v355_v4  ;;  %v372_v0 = vld [vmem:[%s2511_s5 + $0x178] sm:$0xff]  ;;  %v395_v4 = vld [vmem:[%s2511_s5 + $0x230] sm:$0xff]  ;;  %v397_v42 = vld [vmem:[%s2511_s5 + $0x240] sm:$0xff] }
 0x451   : > { %v903_v37 = vpop.f32.mrb[12].mxu1 }
 0x452   : > { %v904_v38 = vadd.f32 %v903_v37, %v418_v36  ;;  %v1787_v39 = vpop.f32.mrb[13].mxu1  ;;  %v351_v36 = vld [vmem:[%s2511_s5 + $0xd0] sm:$0xff]  ;;  %v353_v37 = vld [vmem:[%s2511_s5 + $0xe0] sm:$0xff] }
 0x453   : > { %v358_v39 = vld [vmem:[%s2511_s5 + $0x108] sm:$0xff] }
 0x454   : > { %v907_v40 = vmax.f32 %v904_v38, 0.0  ;;  %v356_v38 = vld [vmem:[%s2511_s5 + $0xf8] sm:$0xff] }
 0x455   : > { %v1874_v41 = vpack.c.bf16 %v358_v39, %v356_v38  ;;  %v396_v38 = vld [vmem:[%s2511_s5 + $0x238] sm:$0xff]  ;;  %v398_v39 = vld [vmem:[%s2511_s5 + $0x248] sm:$0xff] }
 0x456   : > { %1797 = vmatmul.mubr.msk.f32.vlgmr.msra.gmra.mrb[20].mxu0 %vm543_vm2, %v907_v40  ;;  %v1872_v40 = vpack.c.bf16 %v353_v37, %v351_v36  ;;  %v391_v36 = vld [vmem:[%s2511_s5 + $0x210] sm:$0xff]  ;;  %v393_v37 = vld [vmem:[%s2511_s5 + $0x220] sm:$0xff] }
 0x457   : > { %1122 = vmatprep.mubr.f32.mxu0 %v1965_v1  ;;  %1849 = vmatpush1.bf16.msra.mxu0 %v1848_v50  ;;  %v366_v50 = vld [vmem:[%s2511_s5 + $0x148] sm:$0xff] }
 0x458   : > { %1851 = vmatprep.subr.bf16.mxu0 %v1850_v51  ;;  %v1880_v51 = vpack.c.bf16 %v361_v48, %v359_v47  ;;  %v399_v47 = vld [vmem:[%s2511_s5 + $0x250] sm:$0xff]  ;;  %v401_v48 = vld [vmem:[%s2511_s5 + $0x260] sm:$0xff] }
 0x45b   : > { %1853 = vmatpush1.bf16.msra.mxu0 %v1852_v59 }
 0x529   : > { %v977_v53 = vpop.f32.mrb[20].mxu0 }
 0x52a   : > { %v978_v54 = vadd.f32 %v977_v53, %v419_v52  ;;  %v1798_v55 = vpop.f32.mrb[21].mxu0  ;;  %v1882_v52 = vpack.c.bf16 %v366_v50, %v364_v49  ;;  %v363_v53 = vld [vmem:[%s2511_s5 + $0x130] sm:$0xff]  ;;  %v404_v49 = vld [vmem:[%s2511_s5 + $0x278] sm:$0xff]  ;;  %v406_v50 = vld [vmem:[%s2511_s5 + $0x288] sm:$0xff] }
 0x52c   : > { %v981_v56 = vmax.f32 %v978_v54, 0.0  ;;  %v365_v54 = vld [vmem:[%s2511_s5 + $0x140] sm:$0xff] }
 0x52d   : > { %v1884_v55 = vpack.c.bf16 %v365_v54, %v363_v53  ;;  %v403_v53 = vld [vmem:[%s2511_s5 + $0x270] sm:$0xff]  ;;  %v405_v54 = vld [vmem:[%s2511_s5 + $0x280] sm:$0xff] }
 0x52e   : > { %1808 = vmatmul.mubr.msk.f32.vlgmr.msra.gmra.mrb[14].mxu1 %vm543_vm2, %v981_v56  ;;  %v368_v56 = vld [vmem:[%s2511_s5 + $0x158] sm:$0xff] }
 0x52f   : > { %1294 = vmatprep.mubr.f32.mxu1 %v1965_v1  ;;  %1231 = vmatpush1.msra.mxu1 %v333_v2  ;;  %v1886_v59 = vpack.c.bf16 %v370_v57, %v368_v56  ;;  %v374_v2 = vld [vmem:[%s2511_s5 + $0x188] sm:$0xff]  ;;  %v1924_v57 = vpack.c.bf16 %v405_v54, %v403_v53 }
 0x530   : > { %v410_v56 = vld [vmem:[%s2511_s5 + $0x2a8] sm:$0xff] }
 0x532   : > { %1648 = vmatmul.mubr.msk.f32.vlgmr.msra.gmra.mrb[16].mxu1 %vm432_vm1, %v1222_v3 }
 0x533   : > { %1300 = vmatprep.mubr.f32.mxu1 %v1965_v1 }
 0x536   : > { %1649 = vmatmul.mubr.msk.f32.gmra.mrb[18].mxu1 %vm432_vm1, %v1223_v5  ;;  %v1890_v5 = vpack.c.bf16 %v374_v2, %v372_v0  ;;  %v1621_v0 = vld [vmem:[%s2512_s6 + $0x6] ss:$8 sm:$0x3] }
 0x601   : > { %v1051_v61 = vpop.f32.mrb[14].mxu1 }
 0x602   : > { %v1052_v62 = vadd.f32 %v1051_v61, %v420_v60  ;;  %v1809_v63 = vpop.f32.mrb[15].mxu1  ;;  %v367_v60 = vld [vmem:[%s2511_s5 + $0x150] sm:$0xff]  ;;  %v369_v61 = vld [vmem:[%s2511_s5 + $0x160] sm:$0xff] }
 0x603   : > { %v1888_v63 = vpack.c.bf16 %v369_v61, %v367_v60  ;;  %v1308_v60 = vlaneseq }
 0x604   : > { %1643 = vmatmul.mubr.msk.f32.vlgmr.msra.gmra.mrb[22].mxu0 %vm543_vm2, %v1052_v62 }
 0x605   : > { %1209 = vmatprep.mubr.f32.mxu0 %v1965_v1  ;;  %v2333_v58 = vpop.f32.mrb[16].mxu1  ;;  %v1309_v61 = vshrl.u32 %v1308_v60, 7 }
 0x606   : > { %v2341_v62 = vpop.f32.mrb[17].mxu1 }
 0x607   : > { %v1314_v2 = vsub.s32 1, %v1309_v61 }
 0x609   : > { %v2349_v3 = vpop.f32.mrb[18].mxu1  ;;  %v1315_v7 = vrot.slane %v1621_v0, %v1314_v2 }
 0x60a   : > { %v2357_v8 = vpop.f32.mrb[19].mxu1 }
 0x6d7   : > { %v1124_v12 = vpop.f32.mrb[22].mxu0 }
 0x6d8   : > { %v1126_v14 = vpop.f32.mrb[23].mxu0 }
 0x6d9   : > { %1644 = vmatprep.subr.msk.mxu0 %vm1138_vm4, %v1126_v14  ;;  %v377_v14 = vld [vmem:[%s2511_s5 + $0x1a0] sm:$0xff] }
 0x6da   : > { %1645 = vmatpush1.msk.msra.mxu0 %vm1138_vm4, %v1124_v12  ;;  %v375_v12 = vld [vmem:[%s2511_s5 + $0x190] sm:$0xff] }
 0x6db   : > { %1646 = vmatmul.mubr.msk.f32.vlgmr.msra.gmra.mrb[24].mxu0 %vm1131_vm5, %v1129_v15  ;;  %1855 = vmatprep.subr.bf16.mxu0 %v1854_v13  ;;  %v1894_v13 = vpack.c.bf16 %v378_v11, %v376_v10  ;;  %v380_v15 = vld [vmem:[%s2511_s5 + $0x1b8] sm:$0xff] }
 0x6dc   : > { %1215 = vmatprep.mubr.f32.mxu0 %v1965_v1  ;;  %1857 = vmatpush1.bf16.msra.mxu0 %v1856_v16  ;;  %v348_v1 = vld [vmem:[%s2511_s5 + $0xb8] sm:$0xff]  ;;  %v382_v16 = vld [vmem:[%s2511_s5 + $0x1c8] sm:$0xff] }
 0x6dd   : > { %1859 = vmatprep.subr.bf16.mxu0 %v1858_v17  ;;  %v1866_v29 = vpack.c.bf16 %v350_v27, %v348_v1  ;;  %v1896_v17 = vpack.c.bf16 %v377_v14, %v375_v12  ;;  %v1898_v18 = vpack.c.bf16 %v382_v16, %v380_v15  ;;  %1895 = vmatprep.subr.bf16.mxu1 %v1894_v13  ;;  %v388_v1 = vld [vmem:[%s2511_s5 + $0x1f8] sm:$0xff]  ;;  %v390_v27 = vld [vmem:[%s2511_s5 + $0x208] sm:$0xff] }
 0x6df   : > { %1647 = vmatmul.mubr.msk.f32.gmra.mrb[26].mxu0 %vm1131_vm5, %v1130_v22  ;;  %v386_v22 = vld [vmem:[%s2511_s5 + $0x1e8] sm:$0xff]  ;;  %1897 = vmatpush1.bf16.msra.mxu1 %v1896_v17 }
 0x6e0   : > { %1861 = vmatpush1.bf16.msra.mxu0 %v1860_v23  ;;  %v1900_v23 = vpack.c.bf16 %v381_v20, %v379_v19  ;;  %1899 = vmatprep.subr.bf16.mxu1 %v1898_v18 }
 0x6e1   : > { %1863 = vmatprep.subr.bf16.mxu0 %v1862_v24  ;;  %v1902_v24 = vpack.c.bf16 %v386_v22, %v384_v21 }
 0x6e3   : > { %1901 = vmatpush1.bf16.msra.mxu1 %v1900_v23  ;;  %v412_v23 = vld [vmem:[%s2511_s5 + $0x2b8] sm:$0xff] }
 0x6e4   : > { %1865 = vmatpush1.bf16.msra.mxu0 %v1864_v28  ;;  %v1904_v28 = vpack.c.bf16 %v385_v26, %v383_v25  ;;  %1903 = vmatprep.subr.bf16.mxu1 %v1902_v24  ;;  %v414_v24 = vld [vmem:[%s2511_s5 + $0x2c8] sm:$0xff]  ;;  %v411_v26 = vld [vmem:[%s2511_s5 + $0x2b0] sm:$0xff] }
 0x6e5   : > { %1867 = vmatprep.subr.bf16.mxu0 %v1866_v29  ;;  %v1906_v29 = vpack.c.bf16 %v390_v27, %v388_v1  ;;  %v1930_v25 = vpack.c.bf16 %v414_v24, %v412_v23  ;;  %v413_v1 = vld [vmem:[%s2511_s5 + $0x2c0] sm:$0xff] }
 0x6e6   : > { %v1932_v27 = vpack.c.bf16 %v413_v1, %v411_v26 }
 0x6e7   : > { %1905 = vmatpush1.bf16.msra.mxu1 %v1904_v28  ;;  %v1622_v28 = vld [vmem:[%s2512_s6 + $0x7] ss:$8 sm:$0x3] }
 0x6e8   : > { %1869 = vmatpush1.bf16.msra.mxu0 %v1868_v34  ;;  %v1908_v34 = vpack.c.bf16 %v389_v31, %v387_v30  ;;  %1907 = vmatprep.subr.bf16.mxu1 %v1906_v29  ;;  %v1334_v30 = vrot.slane %v1622_v28, %v1314_v2 }
 0x6e9   : > { %1871 = vmatprep.subr.bf16.mxu0 %v1870_v35  ;;  %v1910_v35 = vpack.c.bf16 %v394_v33, %v392_v32 }
 0x6eb   : > { %1909 = vmatpush1.bf16.msra.mxu1 %v1908_v34 }
 0x6ec   : > { %1873 = vmatpush1.bf16.msra.mxu0 %v1872_v40  ;;  %v1912_v40 = vpack.c.bf16 %v393_v37, %v391_v36  ;;  %1911 = vmatprep.subr.bf16.mxu1 %v1910_v35 }
 0x6ed   : > { %1875 = vmatprep.subr.bf16.mxu0 %v1874_v41  ;;  %v1914_v41 = vpack.c.bf16 %v398_v39, %v396_v38 }
 0x6ef   : > { %1913 = vmatpush1.bf16.msra.mxu1 %v1912_v40 }
 0x6f0   : > { %1877 = vmatpush1.bf16.msra.mxu0 %v1876_v45  ;;  %v1916_v45 = vpack.c.bf16 %v397_v42, %v395_v4  ;;  %1915 = vmatprep.subr.bf16.mxu1 %v1914_v41  ;;  %v1623_v42 = vld [vmem:[%s2512_s6 + $0x10] ss:$8 sm:$0x3] }
 0x6f1   : > { %1879 = vmatprep.subr.bf16.mxu0 %v1878_v46  ;;  %v1918_v46 = vpack.c.bf16 %v402_v44, %v400_v43  ;;  %v1432_v44 = vrot.slane %v1623_v42, %v1314_v2 }
 0x6f3   : > { %1917 = vmatpush1.bf16.msra.mxu1 %v1916_v45 }
 0x6f4   : > { %1881 = vmatpush1.bf16.msra.mxu0 %v1880_v51  ;;  %v1920_v51 = vpack.c.bf16 %v401_v48, %v399_v47  ;;  %1919 = vmatprep.subr.bf16.mxu1 %v1918_v46 }
 0x6f5   : > { %1883 = vmatprep.subr.bf16.mxu0 %v1882_v52  ;;  %v1922_v52 = vpack.c.bf16 %v406_v50, %v404_v49 }
 0x6f7   : > { %1921 = vmatpush1.bf16.msra.mxu1 %v1920_v51 }
 0x6f8   : > { %1885 = vmatpush1.bf16.msra.mxu0 %v1884_v55  ;;  %v408_v55 = vld [vmem:[%s2511_s5 + $0x298] sm:$0xff]  ;;  %1923 = vmatprep.subr.bf16.mxu1 %v1922_v52 }
 0x6f9   : > { %1887 = vmatprep.subr.bf16.mxu0 %v1886_v59  ;;  %v1926_v59 = vpack.c.bf16 %v410_v56, %v408_v55 }
 0x6fb   : > { %1925 = vmatpush1.bf16.msra.mxu1 %v1924_v57 }
 0x6fc   : > { %1889 = vmatpush1.bf16.msra.mxu0 %v1888_v63  ;;  %1927 = vmatprep.subr.bf16.mxu1 %v1926_v59  ;;  %v1310_v63 = vsub.s32 0, %v1309_v61 }
 0x6fd   : > { %1891 = vmatprep.subr.bf16.mxu0 %v1890_v5 }
 0x6fe   : > { %v1311_v5 = vrot.slane %v1621_v0, %v1310_v63  ;;  %v1330_v29 = vrot.slane %v1622_v28, %v1310_v63  ;;  %v1428_v43 = vrot.slane %v1623_v42, %v1310_v63 }
 0x700   : > { %1893 = vmatpush1.bf16.msra.mxu0 %v1892_v9 }
 0x7ae   : > { %v1211_v6 = vpop.f32.mrb[24].mxu0 }
 0x7af   : > { %v1297_v9 = vadd.f32 %v2333_v58, %v1211_v6  ;;  %v1213_v10 = vpop.f32.mrb[25].mxu0 }
 0x7b0   : > { %v1299_v11 = vadd.f32 %v2341_v62, %v1213_v10  ;;  %v407_v62 = vld [vmem:[%s2511_s5 + $0x290] sm:$0xff] }
 0x7b1   : > { %v1318_v12 = vadd.f32 %v1311_v5, %v1297_v9 }
 0x7b2   : > { %v1319_v13 = vadd.f32 %v1315_v7, %v1299_v11  ;;  %v1217_v14 = vpop.f32.mrb[26].mxu0 }
 0x7b3   : > { %v1303_v15 = vadd.f32 %v2349_v3, %v1217_v14  ;;  %v1219_v16 = vpop.f32.mrb[27].mxu0  ;;  %v1322_v19 = vmax.f32 %v1318_v12, 0.0  ;;  %v409_v3 = vld [vmem:[%s2511_s5 + $0x2a0] sm:$0xff] }
 0x7b4   : > { %v1323_v17 = vmax.f32 %v1319_v13, 0.0  ;;  %v1305_v18 = vadd.f32 %v2357_v8, %v1219_v16  ;;  %v1928_v8 = vpack.c.bf16 %v409_v3, %v407_v62 }
 0x7b5   : > { %v1320_v20 = vadd.f32 %v1311_v5, %v1303_v15 }
 0x7b6   : > { %v1321_v21 = vadd.f32 %v1315_v7, %v1305_v18  ;;  %1650 = vmatprep.mubr.msk.f32.mxu0 %vm543_vm2, %v1323_v17  ;;  %1929 = vmatpush1.bf16.msra.mxu1 %v1928_v8 }
 0x7b7   : > { %1408 = vmatmul.mubr.f32.vlgmr.msra.gmra.mrb[28].mxu0 %v1322_v19  ;;  %v1324_v58 = vmax.f32 %v1320_v20, 0.0  ;;  %1931 = vmatprep.subr.bf16.mxu1 %v1930_v25 }
 0x7b8   : > { %v1325_v22 = vmax.f32 %v1321_v21, 0.0 }
 0x7ba   : > { %1651 = vmatprep.mubr.msk.f32.mxu0 %vm543_vm2, %v1325_v22  ;;  %1933 = vmatpush1.bf16.msra.mxu1 %v1932_v27 }
 0x7bb   : > { %1414 = vmatmul.mubr.f32.gmra.mrb[30].mxu0 %v1324_v58 }
 0x88a   : > { %v1409_v31 = vpop.f32.mrb[28].mxu0 }
 0x88b   : > { %v1410_v32 = vadd.f32 %v1409_v31, %v1330_v29  ;;  %v1411_v33 = vpop.f32.mrb[29].mxu0 }
 0x88c   : > { %v1412_v34 = vadd.f32 %v1411_v33, %v1334_v30 }
 0x88d   : > { %v1420_v37 = vmax.f32 %v1410_v32, 0.0 }
 0x88e   : > { %v1421_v35 = vmax.f32 %v1412_v34, 0.0  ;;  %v1415_v36 = vpop.f32.mrb[30].mxu0 }
 0x88f   : > { %v1416_v38 = vadd.f32 %v1415_v36, %v1330_v29  ;;  %v1417_v39 = vpop.f32.mrb[31].mxu0 }
 0x890   : > { %v1418_v40 = vadd.f32 %v1417_v39, %v1334_v30  ;;  %1652 = vmatprep.mubr.msk.f32.mxu1 %vm543_vm2, %v1421_v35 }
 0x891   : > { %1506 = vmatmul.mubr.f32.vlgmr.msra.gmra.mrb[20].mxu1 %v1420_v37  ;;  %v1422_v4 = vmax.f32 %v1416_v38, 0.0 }
 0x892   : > { %v1423_v41 = vmax.f32 %v1418_v40, 0.0 }
 0x894   : > { %1653 = vmatprep.mubr.msk.f32.mxu1 %vm543_vm2, %v1423_v41 }
 0x895   : > { %1512 = vmatmul.mubr.f32.gmra.mrb[22].mxu1 %v1422_v4 }
 0x964   : > { %v1507_v45 = vpop.f32.mrb[20].mxu1 }
 0x965   : > { %v1508_v46 = vadd.f32 %v1507_v45, %v1428_v43  ;;  %v1509_v47 = vpop.f32.mrb[21].mxu1 }
 0x966   : > { %v1510_v48 = vadd.f32 %v1509_v47, %v1432_v44 }
 0x967   : > { %v1518_v49 = vmul.f32 0.01, %v1508_v46 }
 0x968   : > { %v1519_v50 = vmul.f32 0.01, %v1510_v48  ;;  %v1513_v51 = vpop.f32.mrb[22].mxu1 }
 0x969   : > { %1949 = vtanh.f32 %v1518_v49  ;;  %v1514_v52 = vadd.f32 %v1513_v51, %v1428_v43  ;;  %v1515_v53 = vpop.f32.mrb[23].mxu1 }
 0x96a   : > { %1951 = vtanh.f32 %v1519_v50  ;;  %v1516_v54 = vadd.f32 %v1515_v53, %v1432_v44 }
 0x96b   : > { %v1520_v55 = vmul.f32 0.01, %v1514_v52 }
 0x96c   : > { %v1521_v56 = vmul.f32 0.01, %v1516_v54 }
 0x96d   : > { %1953 = vtanh.f32 %v1520_v55 }
 0x96e   : > { %1955 = vtanh.f32 %v1521_v56 }
 0x973   : > { %v1950_v57 = vpop.eup %1949 }
 0x974   : > { %v1952_v59 = vpop.eup %1951  ;;  %v1526_v61 = vmul.f32 2.0, %v1950_v57 }
 0x975   : > { %v1527_v60 = vmul.f32 2.0, %v1952_v59 }
 0x977   : > { %v1954_v63 = vpop.eup %1953  ;;  %v1530_v0 = vsel %vm543_vm2, %v1527_v60, 0.0 }
 0x978   : > { %v1956_v2 = vpop.eup %1955  ;;  %v1531_v5 = vadd.f32 %v1530_v0, %v1526_v61  ;;  %v1528_v7 = vmul.f32 2.0, %v1954_v63 }
 0x979   : > { %v1529_v6 = vmul.f32 2.0, %v1956_v2 }
 0x97a   : > { %1532 = vadd.xlane.f32.xlu0 %v1531_v5 }
 0x97b   : > { %v1534_v9 = vsel %vm543_vm2, %v1529_v6, 0.0 }
 0x97c   : > { %v1535_v10 = vadd.f32 %v1534_v9, %v1528_v7 }
 0x97e   : > { %1536 = vadd.xlane.f32.xlu0 %v1535_v10 }
 0xa07   : > { %v1533_v11 = vpop.xlane.xlu0 %1532 }
 0xa08   : > { %v1538_v12 = vmul.f32 0.2, %v1533_v11 }
 0xa0a   : > { %1541 = vst.msk [vmem:[%s302_s16] sm:$0xff] %vm1540_vm6, %v1538_v12 }
 0xa0b   : > { %v1537_v13 = vpop.xlane.xlu0 %1536 }
 0xa0c   : > { %v1539_v14 = vmul.f32 0.2, %v1537_v13 }
 0xa0e   : > { %1542 = vst.msk [vmem:[%s302_s16 + $0x8] sm:$0xff] %vm1540_vm6, %v1539_v14 }
 0xa0f PF: > { %s17_s24 = sadd.s32 1, %s1963_s24  }
 0xa10   : > { %p14_p5 = scmp.ge.s32.totalorder %s17_s24, 4  }
 0xa12   :  { %16 = sbr.rel (!%p14_p5) target bundleno = 1 (0x1), region = 84 }

</bundles_post_ra>
